<compile_context>
chip_gen: v7x
topology: tpu7x:2x2x1
jax: 0.10.0
libtpu: 0.0.40
codegen_flags: <defaults>
</compile_context>

<pallas_src>
import functools

import jax
import jax.numpy as jnp
from jax.experimental import pallas as pl
from jax.experimental.pallas import tpu as pltpu


def _round_up(x, m):
    return ((x + m - 1) // m) * m


def mctsnet_kernel(t_ref,                      # scalar prefetch: [idx, flag] int32 (SMEM)
                   x_ref,                      # (TILE_B, d_in)  f32
                   w1_ref, b1_ref,             # (d_in, H) bf16, (1, H) f32
                   w2_ref, b2_ref,             # (H, H)   bf16, (1, H) f32
                   wh_ref, bh_ref,             # (H, HP)  bf16, (1, HP) f32 (fused heads)
                   temb_ref,                   # (1, 1, H) f32 (selected table row)
                   out_ref,                    # (TILE_B, HP) f32
                   *, action_size):
    A = action_size
    NEG = jnp.float32(-1e30)

    # ---- backbone: Linear -> ReLU -> Linear -> ReLU (bf16 MXU, f32 accum) ----
    xb = x_ref[...].astype(jnp.bfloat16)
    h1 = jnp.dot(xb, w1_ref[...], preferred_element_type=jnp.float32) + b1_ref[...]
    h1 = jnp.maximum(h1, 0.0)
    h2 = jnp.dot(h1.astype(jnp.bfloat16), w2_ref[...],
                 preferred_element_type=jnp.float32) + b2_ref[...]
    h2 = jnp.maximum(h2, 0.0)

    # ---- temporal embedding: flag == 0 -> no-op, flag == 1 -> add row ----
    use_t = t_ref[1].astype(jnp.float32)
    feats = h2 + use_t * temb_ref[0]

    # ---- all five heads as ONE fused matmul (TILE_B, H) x (H, HP) ----
    z = jnp.dot(feats.astype(jnp.bfloat16), wh_ref[...],
                preferred_element_type=jnp.float32) + bh_ref[...]

    col = jax.lax.broadcasted_iota(jnp.int32, z.shape, 1)

    # policy: masked softmax over columns [0, A)
    pol_mask = col < A
    pol_logits = jnp.where(pol_mask, z, NEG)
    pol_max = jnp.max(pol_logits, axis=1, keepdims=True)
    pol_exp = jnp.where(pol_mask, jnp.exp(pol_logits - pol_max), 0.0)
    policy = pol_exp * pl.reciprocal(
        jnp.sum(pol_exp, axis=1, keepdims=True), approx=True)

    # difficulty: masked softmax over columns [A+3, A+6)
    dif_mask = (col >= A + 3) & (col < A + 6)
    dif_logits = jnp.where(dif_mask, z, NEG)
    dif_max = jnp.max(dif_logits, axis=1, keepdims=True)
    dif_exp = jnp.where(dif_mask, jnp.exp(dif_logits - dif_max), 0.0)
    difficulty = dif_exp * pl.reciprocal(
        jnp.sum(dif_exp, axis=1, keepdims=True), approx=True)

    # value / temporal value: tanh columns [A, A+2); confidence: sigmoid col A+2
    tanh_mask = (col >= A) & (col < A + 2)
    sig_mask = col == A + 2
    tanh_z = jnp.tanh(z)
    sig_z = pl.reciprocal(1.0 + jnp.exp(-z), approx=True)

    # assemble one lane-dense slab; padded lanes (col >= A+6) end up zero
    out = policy + difficulty
    out = jnp.where(tanh_mask, tanh_z, out)
    out = jnp.where(sig_mask, sig_z, out)
    out_ref[...] = out


def mctsnet_forward(x, params, knowledge_embedding=None, time_step=0,
                    knowledge_size=0):
    """Wrapper matching MCTSNet.forward semantics."""
    batch = x.shape[0]

    # optional knowledge concat (glue, plain JAX)
    if knowledge_size > 0:
        if knowledge_embedding is not None:
            x = jnp.concatenate([x, knowledge_embedding], axis=1)
        else:
            x = jnp.concatenate(
                [x, jnp.zeros((batch, knowledge_size), x.dtype)], axis=1)

    d_in = x.shape[1]
    H = params["hidden_size"]
    A = params["action_size"]
    HP = params["head_pad"]
    assert A + 6 <= HP

    # batch tiling: big batches -> 128-row MXU-filling tiles, small -> pad to /8
    tile_b = 128 if batch >= 128 else _round_up(batch, 8)
    b_pad = _round_up(batch, tile_b)
    if b_pad != batch:
        x = jnp.pad(x, ((0, b_pad - batch), (0, 0)))
    n_tiles = b_pad // tile_b

    # time step as data: [clamped index, use flag] -> no retrace per value
    t = jnp.asarray(time_step, jnp.int32)
    t_scalars = jnp.stack([jnp.clip(t, 0, 99), (t > 0).astype(jnp.int32)])

    grid_spec = pltpu.PrefetchScalarGridSpec(
        num_scalar_prefetch=1,
        grid=(n_tiles,),
        in_specs=[
            pl.BlockSpec((tile_b, d_in), lambda i, t: (i, 0)),      # x tile
            pl.BlockSpec((d_in, H), lambda i, t: (0, 0)),           # w1 (resident)
            pl.BlockSpec((1, H), lambda i, t: (0, 0)),              # b1
            pl.BlockSpec((H, H), lambda i, t: (0, 0)),              # w2
            pl.BlockSpec((1, H), lambda i, t: (0, 0)),              # b2
            pl.BlockSpec((H, HP), lambda i, t: (0, 0)),             # fused head W
            pl.BlockSpec((1, HP), lambda i, t: (0, 0)),             # fused head b
            pl.BlockSpec((1, 1, H), lambda i, t: (t[0], 0, 0)),     # temb row
        ],
        out_specs=pl.BlockSpec((tile_b, HP), lambda i, t: (i, 0)),
    )

    out = pl.pallas_call(
        functools.partial(mctsnet_kernel, action_size=A),
        out_shape=jax.ShapeDtypeStruct((b_pad, HP), jnp.float32),
        grid_spec=grid_spec,
        compiler_params=pltpu.CompilerParams(
            dimension_semantics=("parallel",)),
    )(t_scalars, x,
      params["w1"], params["b1"], params["w2"], params["b2"],
      params["w_heads"], params["b_heads"], params["time_embedding"])

    out = out[:batch]
    return (out[:, :A],                 # policy
            out[:, A:A + 1],            # value
            out[:, A + 1:A + 2],        # temporal value
            out[:, A + 2:A + 3],        # confidence
            out[:, A + 3:A + 6])        # difficulty


def init_params(key, input_size, action_size, hidden_size, knowledge_size=0):
    """Parameter init mimicking nn.Linear / nn.Embedding defaults.

    Linear weights stored transposed (in, out); head weights fused and padded
    to a lane-dense width; matmul weights cast to bfloat16.
    """
    def linear(k, fan_in, fan_out):
        kw, kb = jax.random.split(k)
        bound = 1.0 / jnp.sqrt(fan_in)
        w = jax.random.uniform(kw, (fan_in, fan_out), jnp.float32, -bound, bound)
        b = jax.random.uniform(kb, (fan_out,), jnp.float32, -bound, bound)
        return w, b

    keys = jax.random.split(key, 8)
    d_in = input_size + knowledge_size
    w1, b1 = linear(keys[0], d_in, hidden_size)
    w2, b2 = linear(keys[1], hidden_size, hidden_size)
    wp, bp = linear(keys[2], hidden_size, action_size)
    wv, bv = linear(keys[3], hidden_size, 1)
    wtv, btv = linear(keys[4], hidden_size, 1)
    wc, bc = linear(keys[5], hidden_size, 1)
    wd, bd = linear(keys[6], hidden_size, 3)
    time_embedding = jax.random.normal(keys[7], (100, hidden_size), jnp.float32)

    # Fuse the five head weights/biases; pad width to a multiple of 128 lanes.
    head_w = jnp.concatenate([wp, wv, wtv, wc, wd], axis=1)
    head_b = jnp.concatenate([bp, bv, btv, bc, bd], axis=0)
    out_w = int(head_w.shape[1])                      # action_size + 6
    head_pad = max(128, _round_up(out_w, 128))
    head_w = jnp.pad(head_w, ((0, 0), (0, head_pad - out_w)))
    head_b = jnp.pad(head_b, (0, head_pad - out_w))

    return dict(
        w1=w1.astype(jnp.bfloat16), b1=b1[None, :],
        w2=w2.astype(jnp.bfloat16), b2=b2[None, :],
        w_heads=head_w.astype(jnp.bfloat16), b_heads=head_b[None, :],
        time_embedding=time_embedding.reshape(100, 1, hidden_size),
        action_size=int(action_size), head_pad=int(head_pad),
        hidden_size=int(hidden_size),
    )


def reference_forward(x, params, time_step=0):
    """Pure-JAX reference mirroring the kernel's bf16/f32 mixed precision."""
    h = jnp.maximum(jnp.dot(x.astype(jnp.bfloat16), params["w1"],
                            preferred_element_type=jnp.float32) + params["b1"], 0.0)
    h = jnp.maximum(jnp.dot(h.astype(jnp.bfloat16), params["w2"],
                            preferred_element_type=jnp.float32) + params["b2"], 0.0)
    if time_step > 0:
        h = h + params["time_embedding"][min(time_step, 99), 0][None, :]
    z = jnp.dot(h.astype(jnp.bfloat16), params["w_heads"],
                preferred_element_type=jnp.float32) + params["b_heads"]
    A = params["action_size"]
    policy = jax.nn.softmax(z[:, :A], axis=1)
    value = jnp.tanh(z[:, A:A + 1])
    tvalue = jnp.tanh(z[:, A + 1:A + 2])
    conf = jax.nn.sigmoid(z[:, A + 2:A + 3])
    diff = jax.nn.softmax(z[:, A + 3:A + 6], axis=1)
    return policy, value, tvalue, conf, diff


if __name__ == "__main__":
    # small shapes consistent with the module
    batch = 8
    input_size = 16
    action_size = 8
    hidden_size = 128
    knowledge_size = 0
    time_step = 3

    key = jax.random.PRNGKey(0)
    kx, kp = jax.random.split(key)
    x = jax.random.normal(kx, (batch, input_size), jnp.float32)
    params = init_params(kp, input_size, action_size, hidden_size, knowledge_size)

    outs = jax.block_until_ready(
        mctsnet_forward(x, params, knowledge_embedding=None,
                        time_step=time_step, knowledge_size=knowledge_size))

    refs = reference_forward(x, params, time_step=time_step)
    names = ("policy", "value", "temporal_value", "confidence", "difficulty")
    for name, o, r in zip(names, outs, refs):
        assert o.shape == r.shape, (name, o.shape, r.shape)
        # tolerance covers approx-reciprocal (EUP) vs exact division
        assert jnp.allclose(o, r, atol=1e-2, rtol=1e-2), (name, o, r)

    print("KERNEL_OK")
</pallas_src>

<mosaic_0001>
module attributes {stable_mosaic.version = 11 : i64} {
  func.func @mctsnet_kernel(%arg0: i32, %arg1: memref<2xi32, #tpu.memory_space<smem>>, %arg2: memref<8x16xf32, #tpu.memory_space<vmem>>, %arg3: memref<16x128xbf16, #tpu.memory_space<vmem>>, %arg4: memref<1x128xf32, #tpu.memory_space<vmem>>, %arg5: memref<128x128xbf16, #tpu.memory_space<vmem>>, %arg6: memref<1x128xf32, #tpu.memory_space<vmem>>, %arg7: memref<128x128xbf16, #tpu.memory_space<vmem>>, %arg8: memref<1x128xf32, #tpu.memory_space<vmem>>, %arg9: memref<1x1x128xf32, #tpu.memory_space<vmem>>, %arg10: memref<8x128xf32, #tpu.memory_space<vmem>>) attributes {dimension_semantics = [#tpu.dimension_semantics<parallel>], iteration_bounds = array<i64: 1>, scalar_prefetch = 1 : i64, scratch_operands = 0 : i64, tpu.core_type = #tpu.core_type<tc>, window_params = [{transform_indices = @transform_0, window_bounds = array<i64: 8, 16>}, {pipeline_mode = #tpu.pipeline_mode<synchronous>, transform_indices = @transform_1, window_bounds = array<i64: 16, 128>}, {pipeline_mode = #tpu.pipeline_mode<synchronous>, transform_indices = @transform_2, window_bounds = array<i64: 1, 128>}, {pipeline_mode = #tpu.pipeline_mode<synchronous>, transform_indices = @transform_3, window_bounds = array<i64: 128, 128>}, {pipeline_mode = #tpu.pipeline_mode<synchronous>, transform_indices = @transform_4, window_bounds = array<i64: 1, 128>}, {pipeline_mode = #tpu.pipeline_mode<synchronous>, transform_indices = @transform_5, window_bounds = array<i64: 128, 128>}, {pipeline_mode = #tpu.pipeline_mode<synchronous>, transform_indices = @transform_6, window_bounds = array<i64: 1, 128>}, {transform_indices = @transform_7, window_bounds = array<i64: 1, 1, 128>}, {transform_indices = @transform_8, window_bounds = array<i64: 8, 128>}]} {
    %c0 = arith.constant 0 : index
    %c0_0 = arith.constant 0 : index
    %0 = vector.load %arg2[%c0, %c0_0] : memref<8x16xf32, #tpu.memory_space<vmem>>, vector<8x16xf32>
    %1 = arith.truncf %0 : vector<8x16xf32> to vector<8x16xbf16>
    %c0_1 = arith.constant 0 : index
    %c0_2 = arith.constant 0 : index
    %2 = vector.load %arg3[%c0_1, %c0_2] : memref<16x128xbf16, #tpu.memory_space<vmem>>, vector<16x128xbf16>
    %cst = arith.constant dense<0.000000e+00> : vector<8x128xf32>
    %3 = tpu.matmul %1, %2, %cst {dimension_numbers = #tpu.dot_dimension_numbers<[1], [0], [0], [1], [0, 0, 1, 1], [], []>} : vector<8x16xbf16>, vector<16x128xbf16>, vector<8x128xf32> -> vector<8x128xf32>
    %c0_3 = arith.constant 0 : index
    %c0_4 = arith.constant 0 : index
    %4 = vector.load %arg4[%c0_3, %c0_4] : memref<1x128xf32, #tpu.memory_space<vmem>>, vector<1x128xf32>
    %5 = vector.broadcast %4 : vector<1x128xf32> to vector<8x128xf32>
    %6 = arith.addf %3, %5 : vector<8x128xf32>
    %cst_5 = arith.constant 0.000000e+00 : f32
    %7 = vector.broadcast %cst_5 : f32 to vector<8x128xf32>
    %8 = arith.maximumf %6, %7 : vector<8x128xf32>
    %9 = arith.truncf %8 : vector<8x128xf32> to vector<8x128xbf16>
    %c0_6 = arith.constant 0 : index
    %c0_7 = arith.constant 0 : index
    %10 = vector.load %arg5[%c0_6, %c0_7] : memref<128x128xbf16, #tpu.memory_space<vmem>>, vector<128x128xbf16>
    %cst_8 = arith.constant dense<0.000000e+00> : vector<8x128xf32>
    %11 = tpu.matmul %9, %10, %cst_8 {dimension_numbers = #tpu.dot_dimension_numbers<[1], [0], [0], [1], [0, 0, 1, 1], [], []>} : vector<8x128xbf16>, vector<128x128xbf16>, vector<8x128xf32> -> vector<8x128xf32>
    %c0_9 = arith.constant 0 : index
    %c0_10 = arith.constant 0 : index
    %12 = vector.load %arg6[%c0_9, %c0_10] : memref<1x128xf32, #tpu.memory_space<vmem>>, vector<1x128xf32>
    %13 = vector.broadcast %12 : vector<1x128xf32> to vector<8x128xf32>
    %14 = arith.addf %11, %13 : vector<8x128xf32>
    %cst_11 = arith.constant 0.000000e+00 : f32
    %15 = vector.broadcast %cst_11 : f32 to vector<8x128xf32>
    %16 = arith.maximumf %14, %15 : vector<8x128xf32>
    %c1 = arith.constant 1 : index
    %17 = memref.load %arg1[%c1] : memref<2xi32, #tpu.memory_space<smem>>
    %18 = arith.sitofp %17 : i32 to f32
    %c0_12 = arith.constant 0 : index
    %c0_13 = arith.constant 0 : index
    %c0_14 = arith.constant 0 : index
    %19 = vector.load %arg9[%c0_12, %c0_13, %c0_14] : memref<1x1x128xf32, #tpu.memory_space<vmem>>, vector<1x1x128xf32>
    %20 = vector.shape_cast %19 : vector<1x1x128xf32> to vector<1x128xf32>
    %21 = vector.broadcast %18 : f32 to vector<1x128xf32>
    %22 = arith.mulf %21, %20 : vector<1x128xf32>
    %23 = vector.broadcast %22 : vector<1x128xf32> to vector<8x128xf32>
    %24 = arith.addf %16, %23 : vector<8x128xf32>
    %25 = arith.truncf %24 : vector<8x128xf32> to vector<8x128xbf16>
    %c0_15 = arith.constant 0 : index
    %c0_16 = arith.constant 0 : index
    %26 = vector.load %arg7[%c0_15, %c0_16] : memref<128x128xbf16, #tpu.memory_space<vmem>>, vector<128x128xbf16>
    %cst_17 = arith.constant dense<0.000000e+00> : vector<8x128xf32>
    %27 = tpu.matmul %25, %26, %cst_17 {dimension_numbers = #tpu.dot_dimension_numbers<[1], [0], [0], [1], [0, 0, 1, 1], [], []>} : vector<8x128xbf16>, vector<128x128xbf16>, vector<8x128xf32> -> vector<8x128xf32>
    %c0_18 = arith.constant 0 : index
    %c0_19 = arith.constant 0 : index
    %28 = vector.load %arg8[%c0_18, %c0_19] : memref<1x128xf32, #tpu.memory_space<vmem>>, vector<1x128xf32>
    %29 = vector.broadcast %28 : vector<1x128xf32> to vector<8x128xf32>
    %30 = arith.addf %27, %29 : vector<8x128xf32>
    %31 = tpu.iota {dimensions = array<i32: 1>} : vector<8x128xi32>
    %c8_i32 = arith.constant 8 : i32
    %32 = vector.broadcast %c8_i32 : i32 to vector<8x128xi32>
    %33 = arith.cmpi slt, %31, %32 : vector<8x128xi32>
    %cst_20 = arith.constant -1.000000e+30 : f32
    %34 = vector.broadcast %cst_20 : f32 to vector<8x128xf32>
    %35 = arith.select %33, %30, %34 : vector<8x128xi1>, vector<8x128xf32>
    %cst_21 = arith.constant dense<0xFF800000> : vector<8xf32>
    %36 = vector.multi_reduction <maximumf>, %35, %cst_21 [1] : vector<8x128xf32> to vector<8xf32>
    %37 = vector.shape_cast %36 : vector<8xf32> to vector<8x1xf32>
    %38 = vector.broadcast %37 : vector<8x1xf32> to vector<8x128xf32>
    %39 = arith.subf %35, %38 : vector<8x128xf32>
    %40 = math.exp %39 : vector<8x128xf32>
    %cst_22 = arith.constant 0.000000e+00 : f32
    %41 = vector.broadcast %cst_22 : f32 to vector<8x128xf32>
    %42 = arith.select %33, %40, %41 : vector<8x128xi1>, vector<8x128xf32>
    %cst_23 = arith.constant dense<0.000000e+00> : vector<8xf32>
    %43 = vector.multi_reduction <add>, %42, %cst_23 [1] : vector<8x128xf32> to vector<8xf32>
    %44 = vector.shape_cast %43 : vector<8xf32> to vector<8x1xf32>
    %45 = tpu.reciprocal %44 {approx = true} : vector<8x1xf32> -> vector<8x1xf32>
    %46 = vector.broadcast %45 : vector<8x1xf32> to vector<8x128xf32>
    %47 = arith.mulf %42, %46 : vector<8x128xf32>
    %c11_i32 = arith.constant 11 : i32
    %48 = vector.broadcast %c11_i32 : i32 to vector<8x128xi32>
    %49 = arith.cmpi sge, %31, %48 : vector<8x128xi32>
    %c14_i32 = arith.constant 14 : i32
    %50 = vector.broadcast %c14_i32 : i32 to vector<8x128xi32>
    %51 = arith.cmpi slt, %31, %50 : vector<8x128xi32>
    %52 = arith.andi %49, %51 : vector<8x128xi1>
    %cst_24 = arith.constant -1.000000e+30 : f32
    %53 = vector.broadcast %cst_24 : f32 to vector<8x128xf32>
    %54 = arith.select %52, %30, %53 : vector<8x128xi1>, vector<8x128xf32>
    %cst_25 = arith.constant dense<0xFF800000> : vector<8xf32>
    %55 = vector.multi_reduction <maximumf>, %54, %cst_25 [1] : vector<8x128xf32> to vector<8xf32>
    %56 = vector.shape_cast %55 : vector<8xf32> to vector<8x1xf32>
    %57 = vector.broadcast %56 : vector<8x1xf32> to vector<8x128xf32>
    %58 = arith.subf %54, %57 : vector<8x128xf32>
    %59 = math.exp %58 : vector<8x128xf32>
    %cst_26 = arith.constant 0.000000e+00 : f32
    %60 = vector.broadcast %cst_26 : f32 to vector<8x128xf32>
    %61 = arith.select %52, %59, %60 : vector<8x128xi1>, vector<8x128xf32>
    %cst_27 = arith.constant dense<0.000000e+00> : vector<8xf32>
    %62 = vector.multi_reduction <add>, %61, %cst_27 [1] : vector<8x128xf32> to vector<8xf32>
    %63 = vector.shape_cast %62 : vector<8xf32> to vector<8x1xf32>
    %64 = tpu.reciprocal %63 {approx = true} : vector<8x1xf32> -> vector<8x1xf32>
    %65 = vector.broadcast %64 : vector<8x1xf32> to vector<8x128xf32>
    %66 = arith.mulf %61, %65 : vector<8x128xf32>
    %c8_i32_28 = arith.constant 8 : i32
    %67 = vector.broadcast %c8_i32_28 : i32 to vector<8x128xi32>
    %68 = arith.cmpi sge, %31, %67 : vector<8x128xi32>
    %c10_i32 = arith.constant 10 : i32
    %69 = vector.broadcast %c10_i32 : i32 to vector<8x128xi32>
    %70 = arith.cmpi slt, %31, %69 : vector<8x128xi32>
    %71 = arith.andi %68, %70 : vector<8x128xi1>
    %c10_i32_29 = arith.constant 10 : i32
    %72 = vector.broadcast %c10_i32_29 : i32 to vector<8x128xi32>
    %73 = arith.cmpi eq, %31, %72 : vector<8x128xi32>
    %74 = math.tanh %30 : vector<8x128xf32>
    %cst_30 = arith.constant 0.000000e+00 : f32
    %75 = vector.broadcast %cst_30 : f32 to vector<8x128xf32>
    %76 = arith.subf %75, %30 : vector<8x128xf32>
    %77 = math.exp %76 : vector<8x128xf32>
    %cst_31 = arith.constant 1.000000e+00 : f32
    %78 = vector.broadcast %cst_31 : f32 to vector<8x128xf32>
    %79 = arith.addf %78, %77 : vector<8x128xf32>
    %80 = tpu.reciprocal %79 {approx = true} : vector<8x128xf32> -> vector<8x128xf32>
    %81 = arith.addf %47, %66 : vector<8x128xf32>
    %82 = arith.select %71, %74, %81 : vector<8x128xi1>, vector<8x128xf32>
    %83 = arith.select %73, %80, %82 : vector<8x128xi1>, vector<8x128xf32>
    %c0_32 = arith.constant 0 : index
    %c0_33 = arith.constant 0 : index
    %84 = vector.load %arg10[%c0_32, %c0_33] : memref<8x128xf32, #tpu.memory_space<vmem>>, vector<8x128xf32>
    tpu.vector_store %arg10[%c0_32, %c0_33], %83 {strides = array<i32>} : memref<8x128xf32, #tpu.memory_space<vmem>>, vector<8x128xf32>,
    return
  }
  func.func @transform_0(%arg0: i32, %arg1: memref<2xi32, #tpu.memory_space<smem>>) -> (i32, i32) {
    %c0_i32 = arith.constant 0 : i32
    %c0_i32_0 = arith.constant 0 : i32
    return %arg0, %c0_i32 : i32, i32
  }
  func.func @transform_1(%arg0: i32, %arg1: memref<2xi32, #tpu.memory_space<smem>>) -> (i32, i32) {
    %c0_i32 = arith.constant 0 : i32
    %c0_i32_0 = arith.constant 0 : i32
    %c0_i32_1 = arith.constant 0 : i32
    return %c0_i32, %c0_i32_0 : i32, i32
  }
  func.func @transform_2(%arg0: i32, %arg1: memref<2xi32, #tpu.memory_space<smem>>) -> (i32, i32) {
    %c0_i32 = arith.constant 0 : i32
    %c0_i32_0 = arith.constant 0 : i32
    %c0_i32_1 = arith.constant 0 : i32
    return %c0_i32, %c0_i32_0 : i32, i32
  }
  func.func @transform_3(%arg0: i32, %arg1: memref<2xi32, #tpu.memory_space<smem>>) -> (i32, i32) {
    %c0_i32 = arith.constant 0 : i32
    %c0_i32_0 = arith.constant 0 : i32
    %c0_i32_1 = arith.constant 0 : i32
    return %c0_i32, %c0_i32_0 : i32, i32
  }
  func.func @transform_4(%arg0: i32, %arg1: memref<2xi32, #tpu.memory_space<smem>>) -> (i32, i32) {
    %c0_i32 = arith.constant 0 : i32
    %c0_i32_0 = arith.constant 0 : i32
    %c0_i32_1 = arith.constant 0 : i32
    return %c0_i32, %c0_i32_0 : i32, i32
  }
  func.func @transform_5(%arg0: i32, %arg1: memref<2xi32, #tpu.memory_space<smem>>) -> (i32, i32) {
    %c0_i32 = arith.constant 0 : i32
    %c0_i32_0 = arith.constant 0 : i32
    %c0_i32_1 = arith.constant 0 : i32
    return %c0_i32, %c0_i32_0 : i32, i32
  }
  func.func @transform_6(%arg0: i32, %arg1: memref<2xi32, #tpu.memory_space<smem>>) -> (i32, i32) {
    %c0_i32 = arith.constant 0 : i32
    %c0_i32_0 = arith.constant 0 : i32
    %c0_i32_1 = arith.constant 0 : i32
    return %c0_i32, %c0_i32_0 : i32, i32
  }
  func.func @transform_7(%arg0: i32, %arg1: memref<2xi32, #tpu.memory_space<smem>>) -> (i32, i32, i32) {
    %c0 = arith.constant 0 : index
    %0 = memref.load %arg1[%c0] : memref<2xi32, #tpu.memory_space<smem>>
    %c0_i32 = arith.constant 0 : i32
    %c0_i32_0 = arith.constant 0 : i32
    %c0_i32_1 = arith.constant 0 : i32
    return %0, %c0_i32, %c0_i32_0 : i32, i32, i32
  }
  func.func @transform_8(%arg0: i32, %arg1: memref<2xi32, #tpu.memory_space<smem>>) -> (i32, i32) {
    %c0_i32 = arith.constant 0 : i32
    %c0_i32_0 = arith.constant 0 : i32
    return %arg0, %c0_i32 : i32, i32
  }
}

</mosaic_0001>

<bundles_post_ra>
// kernel: tpu_custom_call.1
= control target key start
LH: loop header
LB: loop body
LE: loop exit
PB: predicated region body
PF: predicated region fallthrough
CT: control target
= control target key end

     0   :  { %s931_s0 = inlined_call_operand.hbm [shape: s32[2], index: 0, kind: input, shape index: {}]   ;;  %s932_s1 = inlined_call_operand.hbm [shape: f32[8,16], index: 1, kind: input, shape index: {}]   ;;  %s933_s2 = inlined_call_operand.hbm [shape: bf16[16,128], index: 2, kind: input, shape index: {}]   ;;  %s934_s3 = inlined_call_operand.vmem [shape: f32[1,128], index: 3, kind: input, shape index: {}]   ;;  %s935_s4 = inlined_call_operand.hbm [shape: bf16[128,128], index: 4, kind: input, shape index: {}]   ;;  %s936_s5 = inlined_call_operand.vmem [shape: f32[1,128], index: 5, kind: input, shape index: {}]   ;;  %s937_s6 = inlined_call_operand.hbm [shape: bf16[128,128], index: 6, kind: input, shape index: {}]   ;;  %s938_s7 = inlined_call_operand.vmem [shape: f32[1,128], index: 7, kind: input, shape index: {}]   ;;  %s939_s8 = inlined_call_operand.hbm [shape: f32[100,1,128], index: 8, kind: input, shape index: {}]   ;;  %s940_s9 = inlined_call_operand.hbm [shape: f32[8,128], index: 9, kind: output, shape index: {}]  }
   0x1   :  { %s595_s11 = scalar_lea.hbm %s931_s0, 16 }
   0x2   :  { %p596_p0 = scmp.ne.s32.totalorder %s931_s0, %s595_s11  ;;  %p599_p1 = scmp.lt.u32.totalorder %s595_s11, %s931_s0 }
   0x4   :  { %p601_p2 = pnand %p599_p1, %p596_p0 }
   0x6   :  { %604 = shalt.err (!%p601_p2)  }
   0x7   :  { %s749_s16 = smov [#allocation3]  }
   0x8   :  { %15 = dma.hbm_to_smem %s931_s0, 16, %s749_s16, [#allocation2] }
   0x9   :  { %739 = dma.done.wait [#allocation2], 16 }
   0xa   :  { %740 = vsyncadd [#allocation2], 4294967280 }
   0xb   :  { %17 = sfence }
   0xc   :  { %18 = vsyncpa [#allocation5], 0 }
   0xd   :  { %19 = vsyncpa [#allocation8], 0 }
   0xe   :  { %20 = vsyncpa [#allocation11], 0 }
   0xf   :  { %21 = vsyncpa [#allocation6], 0  ;;  %s750_s19 = smov [#allocation7]   ;;  %s605_s23 = scalar_lea.hbm %s933_s2, 128 }
  0x10   :  { %s37_s20 = sshll.u32 %s750_s19, 4  ;;  %p606_p3 = scmp.ne.s32.totalorder %s933_s2, %s605_s23  ;;  %s38_s20 = int_to_ptr.vmem [resolvable:$true] %s37_s20 }
  0x11   :  { %p609_p4 = scmp.lt.u32.totalorder %s605_s23, %s933_s2 }
  0x13   :  { %p611_p5 = pnand %p609_p4, %p606_p3 }
  0x15   :  { %614 = shalt.err (!%p611_p5)
}
  0x16   :  { %s615_s27 = scalar_lea.vmem %s38_s20, 128  ;;  %p620_p7 = scmp.lt.s32.totalorder %s38_s20, %s38_s20 }
  0x17   :  { %p616_p6 = scmp.ne.s32.totalorder %s38_s20, %s615_s27  ;;  %p621_p8 = scmp.lt.s32.totalorder %s615_s27, %s615_s27 }
  0x19   :  { %p622_p9 = por %p621_p8, %p620_p7 }
  0x1b   :  { %p623_p10 = pnand %p622_p9, %p616_p6 }
  0x1d   :  { %626 = shalt.err (!%p623_p10)
}
  0x1e   :  { %s751_s28 = smov 64   ;;  %s752_s29 = smov 4  }
  0x1f   :  { %43 = dma.hbm_to_vmem [thread:$0]  %s933_s2, 128, %s38_s20, [#allocation8], %s751_s28, %s751_s28, %s752_s29  }
  0x20   :  { %s753_s11 = smov [#allocation10]   ;;  %s754_s13 = smov [#allocation4]  }
  0x21   :  { %s65_s12 = sshll.u32 %s753_s11, 4  ;;  %s28_s14 = sshll.u32 %s754_s13, 4  ;;  %s66_s12 = int_to_ptr.vmem [resolvable:$true] %s65_s12  ;;  %s29_s14 = int_to_ptr.vmem [resolvable:$true] %s28_s14 }
  0x22   :  { %s627_s17 = scalar_lea.hbm %s937_s6, 1024 }
  0x23   :  { %p628_p11 = scmp.ne.s32.totalorder %s937_s6, %s627_s17  ;;  %p631_p12 = scmp.lt.u32.totalorder %s627_s17, %s937_s6 }
  0x25   :  { %p633_p13 = pnand %p631_p12, %p628_p11 }
  0x27   :  { %636 = shalt.err (!%p633_p13)
}
  0x28   :  { %s637_s2 = scalar_lea.vmem %s66_s12, 1024  ;;  %p642_p1 = scmp.lt.s32.totalorder %s66_s12, %s66_s12 }
  0x29   :  { %p638_p0 = scmp.ne.s32.totalorder %s66_s12, %s637_s2  ;;  %p643_p2 = scmp.lt.s32.totalorder %s637_s2, %s637_s2 }
  0x2b   :  { %p644_p3 = por %p643_p2, %p642_p1 }
  0x2d   :  { %p645_p4 = pnand %p644_p3, %p638_p0 }
  0x2f   :  { %648 = shalt.err (!%p645_p4)
}
  0x30   :  { %71 = dma.hbm_to_vmem [thread:$0]  %s937_s6, 1024, %s66_s12, [#allocation11], %s751_s28, %s751_s28, %s752_s29  }
  0x31   :  { %s649_s26 = scalar_lea.hbm %s932_s1, 128 }
  0x32   :  { %p650_p5 = scmp.ne.s32.totalorder %s932_s1, %s649_s26  ;;  %p653_p6 = scmp.lt.u32.totalorder %s649_s26, %s932_s1 }
  0x34   :  { %p655_p7 = pnand %p653_p6, %p650_p5 }
  0x36   :  { %658 = shalt.err (!%p655_p7)
}
  0x37   :  { %s659_s11 = scalar_lea.vmem %s29_s14, 128  ;;  %p664_p9 = scmp.lt.s32.totalorder %s29_s14, %s29_s14 }
  0x38   :  { %p660_p8 = scmp.ne.s32.totalorder %s29_s14, %s659_s11  ;;  %p665_p10 = scmp.lt.s32.totalorder %s659_s11, %s659_s11 }
  0x3a   :  { %p666_p11 = por %p665_p10, %p664_p9 }
  0x3c   :  { %p667_p12 = pnand %p666_p11, %p660_p8 }
  0x3e   :  { %670 = shalt.err (!%p667_p12)
}
  0x3f   :  { %31 = dma.hbm_to_vmem [thread:$0]  %s932_s1, 128, %s29_s14, [#allocation5]  }
  0x40   :  { %s755_s13 = smov [#allocation9]   ;;  %s76_s16 = sld [smem:[#allocation3]] }
  0x41   :  { %s51_s15 = sshll.u32 %s755_s13, 4  ;;  %s671_s19 = scalar_lea.hbm %s935_s4, 1024  ;;  %s52_s15 = int_to_ptr.vmem [resolvable:$true] %s51_s15 }
  0x42   :  { %p672_p13 = scmp.ne.s32.totalorder %s935_s4, %s671_s19  ;;  %p675_p0 = scmp.lt.u32.totalorder %s671_s19, %s935_s4 }
  0x44   :  { %p677_p1 = pnand %p675_p0, %p672_p13 }
  0x46   :  { %680 = shalt.err (!%p677_p1)
}
  0x47   :  { %s681_s23 = scalar_lea.vmem %s52_s15, 1024  ;;  %p686_p3 = scmp.lt.s32.totalorder %s52_s15, %s52_s15 }
  0x48   :  { %p682_p2 = scmp.ne.s32.totalorder %s52_s15, %s681_s23  ;;  %p687_p4 = scmp.lt.s32.totalorder %s681_s23, %s681_s23 }
  0x4a   :  { %p688_p5 = por %p687_p4, %p686_p3 }
  0x4c   :  { %p689_p6 = pnand %p688_p5, %p682_p2 }
  0x4e   :  { %692 = shalt.err (!%p689_p6)
}
  0x4f   :  { %57 = dma.hbm_to_vmem [thread:$0]  %s935_s4, 1024, %s52_s15, [#allocation8], %s751_s28, %s751_s28, %s752_s29  }
  0x50   :  { %s756_s24 = smov [#allocation12]   ;;  %s464_s26 = sshll.u32 %s76_s16, 4 }
  0x51   :  { %s83_s25 = sshll.u32 %s756_s24, 4  ;;  %s81_s30 = scalar_lea.hbm %s939_s8, %s464_s26  ;;  %s84_s25 = int_to_ptr.vmem [resolvable:$true] %s83_s25 }
  0x52   :  { %s693_s10 = scalar_lea.hbm %s81_s30, 16  ;;  %s695_s12 = scalar_lea.hbm %s939_s8, 1600 }
  0x53   :  { %p694_p7 = scmp.ne.s32.totalorder %s81_s30, %s693_s10  ;;  %p696_p8 = scmp.lt.u32.totalorder %s81_s30, %s939_s8 }
  0x54   :  { %p697_p9 = scmp.lt.u32.totalorder %s695_s12, %s693_s10  ;;  %p699_p11 = scmp.lt.u32.totalorder %s693_s10, %s81_s30 }
  0x56   :  { %p698_p10 = por %p697_p9, %p696_p8 }
  0x58   :  { %p700_p12 = por %p699_p11, %p698_p10 }
  0x5a   :  { %p701_p13 = pnand %p700_p12, %p694_p7 }
  0x5c   :  { %704 = shalt.err (!%p701_p13)
}
  0x5d   :  { %s705_s4 = scalar_lea.vmem %s84_s25, 16  ;;  %s709_s28 = scalar_lea.vmem %s84_s25, 32 }
  0x5e   :  { %p706_p0 = scmp.ne.s32.totalorder %s84_s25, %s705_s4  ;;  %p710_p1 = scmp.lt.s32.totalorder %s84_s25, %s84_s25 }
  0x5f   :  { %p711_p2 = scmp.lt.s32.totalorder %s709_s28, %s705_s4 }
  0x61   :  { %p712_p3 = por %p711_p2, %p710_p1 }
  0x63   :  { %p713_p4 = pnand %p712_p3, %p706_p0 }
  0x65   :  { %716 = shalt.err (!%p713_p4)
}
  0x66   :  { %86 = dma.hbm_to_vmem [thread:$0]  %s81_s30, 16, %s84_s25, [#allocation11]  }
  0x67   :  { %741 = dma.done.wait [#allocation5], 128  }
  0x68   :  { %742 = vsyncadd [#allocation5], 4294967168 }
  0x69   :  { %743 = dma.done.wait [#allocation8], 1152  }
  0x6a   :  { %744 = vsyncadd [#allocation8], 4294966144 }
  0x6b   :  { %745 = dma.done.wait [#allocation11], 1040  }
  0x6c   :  { %746 = vsyncadd [#allocation11], 4294966256  ;;  %v757_v0 = vmov 0.0   ;;  %vm758_vm0 = vmmov 0   ;;  %v564_v1 = vld [vmem:[#allocation7] sm:$0xff]   ;;  %v104_v2 = vld [vmem:[#allocation4] sm:$0xff]  ;;  %v285_v28 = vlaneseq }
  0x6d   :  { %507 = vmatprep.subr.bf16.mxu0 %v757_v0  ;;  %509 = vmatprep.mubr.msk.bf16.mxu0 %vm758_vm0, %v757_v0  ;;  %v105_v3 = vpack.c.bf16 %v104_v2, %v104_v2  ;;  %vm121_vm1 = vcmask 130048   ;;  %v565_v4 = vld [vmem:[#allocation9] sm:$0xff]   ;;  %v566_v5 = vld [vmem:[#allocation9 + $0x8] sm:$0xff]   ;;  %v567_v6 = vld [vmem:[#allocation9 + $0x10] sm:$0xff]   ;;  %s477_s15 = sld [smem:[#allocation3 + $0x1]] }
  0x6e   :  { %513 = vmatprep.subr.bf16.mxu1 %v757_v0  ;;  %529 = vmatprep.mubr.msk.bf16.mxu1 %vm758_vm0, %v757_v0  ;;  %v568_v7 = vld [vmem:[#allocation9 + $0x18] sm:$0xff]   ;;  %v569_v8 = vld [vmem:[#allocation9 + $0x20] sm:$0xff]   ;;  %v570_v9 = vld [vmem:[#allocation9 + $0x28] sm:$0xff]   ;;  %v286_v29 = vshrl.u32 %v285_v28, 7  ;;  %v404_v44 = vand.u32 127, %v285_v28 }
  0x6f   :  { %508 = vmatpush3.bf16.msra.mxu0 %v564_v1  ;;  %514 = vmatpush3.bf16.msra.mxu1 %v565_v4  ;;  %v571_v10 = vld [vmem:[#allocation9 + $0x30] sm:$0xff]   ;;  %v572_v11 = vld [vmem:[#allocation9 + $0x38] sm:$0xff]   ;;  %v573_v12 = vld [vmem:[#allocation10] sm:$0xff]  }
  0x70   :  { %533 = vmatprep.subr.bf16.mxu0 %v757_v0  ;;  %515 = vmatprep.subr.bf16.mxu1 %v757_v0  ;;  %v574_v13 = vld [vmem:[#allocation10 + $0x8] sm:$0xff]   ;;  %v575_v14 = vld [vmem:[#allocation10 + $0x10] sm:$0xff]   ;;  %v576_v15 = vld [vmem:[#allocation10 + $0x18] sm:$0xff]   ;;  %v287_v33 = vsub.s32 0, %v286_v29  ;;  %vm405_vm2 = vcmp.lt.s32.totalorder %v404_v44, 8  ;;  %vm417_vm3 = vcmp.ge.s32.totalorder %v404_v44, 11 }
  0x71   :  { %v577_v16 = vld [vmem:[#allocation10 + $0x20] sm:$0xff]   ;;  %v578_v17 = vld [vmem:[#allocation10 + $0x28] sm:$0xff]   ;;  %v465_v18 = vld [vmem:[%s934_s3] ss:$0 sm:$0xff]  ;;  %vm418_vm4 = vcmp.lt.s32.totalorder %v404_v44, 14  ;;  %vm431_vm6 = vcmp.ge.s32.totalorder %v404_v44, 8 }
  0x72   :  { %510 = vmatmul.mubr.msk.bf16.vlgmr.msra.gmra.mrb[0].mxu0 %vm121_vm1, %v105_v3  ;;  %v579_v26 = vld [vmem:[#allocation10 + $0x30] sm:$0xff]   ;;  %v580_v27 = vld [vmem:[#allocation10 + $0x38] sm:$0xff]   ;;  %v281_v30 = vld [vmem:[#allocation12] sm:$0x1]  ;;  %vm432_vm7 = vcmp.lt.s32.totalorder %v404_v44, 10  ;;  %vm434_vm9 = vcmp.eq.s32.totalorder %v404_v44, 10 }
  0x73   :  { %549 = vmatprep.mubr.msk.bf16.mxu0 %vm758_vm0, %v757_v0  ;;  %516 = vmatpush3.bf16.msra.mxu1 %v566_v5  ;;  %s280_s16 = scvt.s32.f32 %s477_s15  ;;  %v468_v34 = vld [vmem:[%s936_s5] ss:$0 sm:$0xff]  ;;  %vm419_vm5 = vmand %vm417_vm3, %vm418_vm4  ;;  %s759_s5 = smov [#allocation13]  }
  0x74   :  { %517 = vmatprep.subr.bf16.mxu1 %v757_v0  ;;  %534 = vmatpush3.bf16.msra.mxu0 %v573_v12  ;;  %v478_v45 = vld [vmem:[%s938_s7] ss:$0 sm:$0xff]  ;;  %vm433_vm8 = vmand %vm431_vm6, %vm432_vm7  ;;  %s451_s7 = sshll.u32 %s759_s5, 4  ;;  %s452_s7 = int_to_ptr.vmem [resolvable:$true] %s451_s7 }
  0x75   :  { %535 = vmatprep.subr.bf16.mxu0 %v757_v0  ;;  %v282_v31 = vstv %s280_s16  ;;  %s717_s22 = scalar_lea.vmem %s452_s7, 128  ;;  %p722_p6 = scmp.lt.s32.totalorder %s452_s7, %s452_s7 }
  0x76   :  { %v283_v32 = vmul.f32 %v282_v31, %v281_v30  ;;  %p718_p5 = scmp.ne.s32.totalorder %s452_s7, %s717_s22  ;;  %p723_p7 = scmp.lt.s32.totalorder %s717_s22, %s717_s22 }
  0x77   :  { %518 = vmatpush3.bf16.msra.mxu1 %v567_v6 }
  0x78   :  { %519 = vmatprep.subr.bf16.mxu1 %v757_v0  ;;  %536 = vmatpush3.bf16.msra.mxu0 %v574_v13  ;;  %v288_v37 = vrot.slane %v283_v32, %v287_v33  ;;  %p724_p8 = por %p723_p7, %p722_p6 }
  0x79   :  { %537 = vmatprep.subr.bf16.mxu0 %v757_v0 }
  0x7a   :  { %p725_p9 = pnand %p724_p8, %p718_p5 }
  0x7b   :  { %520 = vmatpush3.bf16.msra.mxu1 %v568_v7 }
  0x7c   :  { %521 = vmatprep.subr.bf16.mxu1 %v757_v0  ;;  %538 = vmatpush3.bf16.msra.mxu0 %v575_v14 }
  0x7d   :  { %539 = vmatprep.subr.bf16.mxu0 %v757_v0 }
  0x7f   :  { %522 = vmatpush3.bf16.msra.mxu1 %v569_v8 }
  0x80   :  { %523 = vmatprep.subr.bf16.mxu1 %v757_v0  ;;  %540 = vmatpush3.bf16.msra.mxu0 %v576_v15 }
  0x81   :  { %541 = vmatprep.subr.bf16.mxu0 %v757_v0 }
  0x83   :  { %524 = vmatpush3.bf16.msra.mxu1 %v570_v9 }
  0x84   :  { %525 = vmatprep.subr.bf16.mxu1 %v757_v0  ;;  %542 = vmatpush3.bf16.msra.mxu0 %v577_v16 }
  0x85   :  { %543 = vmatprep.subr.bf16.mxu0 %v757_v0 }
  0x87   :  { %526 = vmatpush3.bf16.msra.mxu1 %v571_v10 }
  0x88   :  { %527 = vmatprep.subr.bf16.mxu1 %v757_v0  ;;  %544 = vmatpush3.bf16.msra.mxu0 %v578_v17 }
  0x89   :  { %545 = vmatprep.subr.bf16.mxu0 %v757_v0 }
  0x8b   :  { %528 = vmatpush3.bf16.msra.mxu1 %v572_v11 }
  0x8c   :  { %546 = vmatpush3.bf16.msra.mxu0 %v579_v26 }
  0x8d   :  { %547 = vmatprep.subr.bf16.mxu0 %v757_v0 }
  0x90   :  { %548 = vmatpush3.bf16.msra.mxu0 %v580_v27 }
 0x145   :  { %v159_v19 = vpop.f32.mrb[0].mxu0 }
 0x146   :  { %v160_v20 = vadd.f32 %v465_v18, %v159_v19  ;;  %v511_v21 = vpop.f32.mrb[1].mxu0 }
 0x147   :  { %v162_v22 = vpop.f32.mrb[2].mxu0 }
 0x148   :  { %v165_v23 = vmax.f32 %v160_v20, 0.0  ;;  %v512_v24 = vpop.f32.mrb[3].mxu0 }
 0x14a   :  { %v166_v25 = vpack.c.bf16 %v165_v23, %v165_v23 }
 0x14c   :  { %530 = vmatmul.mubr.bf16.vlgmr.msra.gmra.mrb[0].mxu1 %v166_v25 }
 0x21f   :  { %v272_v35 = vpop.f32.mrb[0].mxu1 }
 0x220   :  { %v273_v36 = vadd.f32 %v468_v34, %v272_v35  ;;  %v531_v38 = vpop.f32.mrb[1].mxu1 }
 0x221   :  { %v275_v39 = vpop.f32.mrb[2].mxu1 }
 0x222   :  { %v278_v40 = vmax.f32 %v273_v36, 0.0  ;;  %v532_v41 = vpop.f32.mrb[3].mxu1 }
 0x224   :  { %v290_v42 = vadd.f32 %v288_v37, %v278_v40 }
 0x226   :  { %v291_v43 = vpack.c.bf16 %v290_v42, %v290_v42 }
 0x228   :  { %550 = vmatmul.mubr.bf16.vlgmr.msra.gmra.mrb[4].mxu0 %v291_v43 }
 0x2fb   :  { %v397_v46 = vpop.f32.mrb[4].mxu0 }
 0x2fc   :  { %v398_v47 = vadd.f32 %v478_v45, %v397_v46  ;;  %v551_v48 = vpop.f32.mrb[5].mxu0 }
 0x2fd   :  { %v400_v49 = vpop.f32.mrb[6].mxu0 }
 0x2fe   :  { %v552_v50 = vpop.f32.mrb[7].mxu0  ;;  %v406_v51 = vsel %vm405_vm2, %v398_v47, -1e+30  ;;  %v420_v52 = vsel %vm419_vm5, %v398_v47, -1e+30  ;;  %v436_v63 = vsub.f32 0.0, %v398_v47 }
 0x2ff   :  { %407 = vmax.xlane.f32.xlu0 %v406_v51 }
 0x300   :  { %v437_v0 = vmul.f32 1.442695, %v436_v63 }
 0x303   :  { %421 = vmax.xlane.f32.xlu0 %v420_v52 }
 0x38c   :  { %v408_v53 = vpop.xlane.xlu0 %407 }
 0x38d   :  { %v409_v54 = vsub.f32 %v406_v51, %v408_v53 }
 0x38f   :  { %v410_v55 = vmul.f32 1.442695, %v409_v54 }
 0x390   :  { %v422_v56 = vpop.xlane.xlu0 %421 }
 0x391   :  { %581 = vpow2.f32 %v410_v55  ;;  %v423_v57 = vsub.f32 %v420_v52, %v422_v56 }
 0x393   :  { %v424_v58 = vmul.f32 1.442695, %v423_v57 }
 0x395   :  { %583 = vpow2.f32 %v424_v58 }
 0x396   :  { %585 = vpow2.f32 %v437_v0 }
 0x39b   :  { %v582_v59 = vpop.eup %581 }
 0x39c   :  { %v412_v60 = vsel %vm405_vm2, %v582_v59, 0.0 }
 0x39d   :  { %413 = vadd.xlane.f32.xlu1 %v412_v60 }
 0x39f   :  { %v584_v61 = vpop.eup %583 }
 0x3a0   :  { %v426_v62 = vsel %vm419_vm5, %v584_v61, 0.0  ;;  %v586_v2 = vpop.eup %585 }
 0x3a1   :  { %427 = vadd.xlane.f32.xlu1 %v426_v62  ;;  %v439_v4 = vadd.f32 1.0, %v586_v2 }
 0x42a   :  { %v414_v1 = vpop.xlane.xlu1 %413 }
 0x42b   :  { %587 = vrcp.f32 %v414_v1 }
 0x42e   :  { %v428_v3 = vpop.xlane.xlu1 %427 }
 0x42f   :  { %589 = vrcp.f32 %v428_v3 }
 0x430   :  { %591 = vtanh.f32 %v398_v47 }
 0x431   :  { %593 = vrcp.f32 %v439_v4 }
 0x435   :  { %v588_v5 = vpop.eup %587 }
 0x436   :  { %v416_v8 = vmul.f32 %v588_v5, %v412_v60 }
 0x439   :  { %v590_v6 = vpop.eup %589 }
 0x43a   :  { %v430_v7 = vmul.f32 %v590_v6, %v426_v62  ;;  %v592_v10 = vpop.eup %591 }
 0x43b   :  { %v594_v11 = vpop.eup %593 }
 0x43c   :  { %v441_v9 = vadd.f32 %v430_v7, %v416_v8 }
 0x43e   :  { %v442_v12 = vsel %vm433_vm8, %v592_v10, %v441_v9 }
 0x43f   :  { %v443_v13 = vsel %vm434_vm9, %v594_v11, %v442_v12 }
 0x440   :  { %444 = vst [vmem:[#allocation13] sm:$0xff] %v443_v13 }
 0x441   :  { %728 = shalt.err (!%p725_p9)
}
 0x442   :  { %s729_s23 = scalar_lea.hbm %s940_s9, 128 }
 0x443   :  { %p730_p10 = scmp.ne.s32.totalorder %s940_s9, %s729_s23  ;;  %p733_p11 = scmp.lt.u32.totalorder %s729_s23, %s940_s9 }
 0x445   :  { %p735_p12 = pnand %p733_p11, %p730_p10 }
 0x447   :  { %738 = shalt.err (!%p735_p12)
}
 0x448   :  { %454 = dma.vmem_to_hbm [thread:$0]  %s452_s7, 128, %s940_s9, [#allocation6]  }
 0x449   :  { %747 = dma.done.wait [#allocation6], 128  }
 0x44a   :  { %748 = vsyncadd [#allocation6], 4294967168 }
 0x44b   :  { %458 = vsyncpa [#allocation5], 1 }
 0x44c   :  { %459 = vsyncpa [#allocation8], 1 }
 0x44d   :  { %460 = vsyncpa [#allocation11], 1 }
 0x44e   :  { %461 = vsyncpa [#allocation6], 1 }

</bundles_post_ra>
